<compile_context>
chip_gen: v7x
topology: tpu7x:2x2x1
jax: 0.10.0
libtpu: 0.0.40
codegen_flags: <defaults>
</compile_context>

<pallas_src>
import functools
import numpy as np
import jax
import jax.numpy as jnp
from jax.experimental import pallas as pl
from jax.experimental.pallas import tpu as pltpu

LANE = 128


def _round_up(x, m):
    return -(-x // m) * m


# ---------------------------------------------------------------------------
# Pallas kernel: fused 3-layer MLP (bf16 MXU matmuls, f32 accumulate/epilogue)
# Specialized to nb_hidden_layers=2 / ReLU (matches the tested PyTorch config).
# ---------------------------------------------------------------------------
def _mlp_kernel(x_ref, w0_ref, b0_ref, w1_ref, b1_ref, w2_ref, b2_ref, o_ref):
    # layer 0: (tw x tw) conv as matmul over im2col'ed patches
    h = jnp.dot(x_ref[...], w0_ref[...], preferred_element_type=jnp.float32)
    h = jnp.maximum(h + b0_ref[...], 0.0)                       # f32 epilogue
    # hidden 1x1 conv
    h = jnp.dot(h.astype(jnp.bfloat16), w1_ref[...],
                preferred_element_type=jnp.float32)
    h = jnp.maximum(h + b1_ref[...], 0.0)
    # output 1x1 conv (no non-linearity, matches nn.Sequential tail)
    o = jnp.dot(h.astype(jnp.bfloat16), w2_ref[...],
                preferred_element_type=jnp.float32)
    o_ref[...] = (o + b2_ref[...]).astype(o_ref.dtype)          # slim (tile_p, num_out)


def _fused_mlp(x_col, w0, b0, w1, b1, w2, b2, *, tile_p):
    P, K = x_col.shape
    Hp = w0.shape[1]
    O = w2.shape[1]                      # true num_out (not lane-padded)
    assert tile_p % 8 == 0
    n_tiles = pl.cdiv(P, tile_p)         # partial last block handled by Pallas

    const = lambda shape: pl.BlockSpec(shape, lambda i: (0, 0))
    flops = 2 * P * (K * Hp + Hp * Hp + Hp * O)
    bytes_accessed = int(
        x_col.size * x_col.dtype.itemsize
        + sum(a.size * a.dtype.itemsize for a in (w0, b0, w1, b1, w2, b2))
        + P * O * 4)

    return pl.pallas_call(
        _mlp_kernel,
        out_shape=jax.ShapeDtypeStruct((P, O), jnp.float32),
        grid_spec=pl.GridSpec(
            grid=(n_tiles,),
            in_specs=[
                pl.BlockSpec((tile_p, K), lambda i: (i, 0)),   # X row tile (pipelined)
                const((K, Hp)),  const((1, Hp)),               # W0, b0 (VMEM-resident)
                const((Hp, Hp)), const((1, Hp)),               # W1, b1
                const((Hp, O)),  const((1, O)),                # W2, b2
            ],
            out_specs=pl.BlockSpec((tile_p, O), lambda i: (i, 0)),
        ),
        compiler_params=pltpu.CompilerParams(
            dimension_semantics=("parallel",)),   # row tiles shard across TCs on v7x
        cost_estimate=pl.CostEstimate(
            flops=flops, transcendentals=0, bytes_accessed=bytes_accessed),
    )(x_col, w0, b0, w1, b1, w2, b2)


# ---------------------------------------------------------------------------
# Parameter padding for the kernel (hidden lane-padded to 128, bf16 weights;
# num_out is NOT padded -> slim output).
# ---------------------------------------------------------------------------
def _pad_params_for_kernel(params):
    w0, b0, w1, b1, w2, b2 = params      # w0:(K,H) b0:(1,H) w1:(H,H) w2:(H,O) b2:(1,O)
    K, H = w0.shape
    O = w2.shape[1]
    Hp = _round_up(H, LANE)
    bf = jnp.bfloat16
    w0p = jnp.zeros((K, Hp), bf).at[:, :H].set(w0.astype(bf))
    b0p = jnp.zeros((1, Hp), jnp.float32).at[:, :H].set(b0)
    w1p = jnp.zeros((Hp, Hp), bf).at[:H, :H].set(w1.astype(bf))
    b1p = jnp.zeros((1, Hp), jnp.float32).at[:, :H].set(b1)
    w2p = jnp.zeros((Hp, O), bf).at[:H, :].set(w2.astype(bf))
    b2p = b2.astype(jnp.float32)
    return (w0p, b0p, w1p, b1p, w2p, b2p)


# ---------------------------------------------------------------------------
# FullyConnected forward (glue: im2col + reshapes in plain JAX)
# ---------------------------------------------------------------------------
@functools.partial(jax.jit, static_argnames=("tile_width", "tile_p"))
def fully_connected_forward(x_nchw, params, *, tile_width, tile_p=2048):
    """x_nchw: [N, num_in, H, W] float32  ->  [N, num_out, H-tw+1, W-tw+1]"""
    N, C, H, W = x_nchw.shape
    tw = tile_width
    Ho, Wo = H - tw + 1, W - tw + 1
    num_out = params[4].shape[1]          # w2: (hidden, num_out)
    K = C * tw * tw
    P = N * Ho * Wo

    # im2col in one XLA op (NHWC so the big patch tensor needs no transpose).
    # Output feature ordering is (c, ky, kx), matching the flattened PyTorch
    # Conv2d weight layout used in init_params/reference.
    x_nhwc = jnp.transpose(x_nchw, (0, 2, 3, 1))
    patches = jax.lax.conv_general_dilated_patches(
        x_nhwc, filter_shape=(tw, tw), window_strides=(1, 1), padding="VALID",
        dimension_numbers=("NHWC", "HWIO", "NHWC"))     # [N, Ho, Wo, K]
    x_col = patches.reshape(P, K).astype(jnp.bfloat16)  # no row padding

    # Clamp the tile for tiny inputs (keeps it a multiple of 8 either way).
    tile_eff = min(tile_p, _round_up(P, 8))
    kparams = _pad_params_for_kernel(params)
    out_flat = _fused_mlp(x_col, *kparams, tile_p=tile_eff)   # [P, num_out] f32

    out = out_flat.reshape(N, Ho, Wo, num_out)          # free contiguous reshape
    # NCHW at the module boundary to match the PyTorch spec; if the consumer
    # accepts NHWC, return `out` directly and skip this transpose round-trip.
    return jnp.transpose(out, (0, 3, 1, 2))


# ---------------------------------------------------------------------------
# Deterministic parameter init (synthetic, PyTorch shapes, f32)
# ---------------------------------------------------------------------------
def init_params(key, num_in, num_out, tile_width, hidden):
    k0, k1, k2, k3, k4, k5 = jax.random.split(key, 6)
    K = num_in * tile_width * tile_width
    # PyTorch conv weight (out,in,kh,kw) flattened to (out, in*kh*kw), then
    # transposed to (K, out) for right-multiplication.
    w0 = jax.random.normal(k0, (hidden, K), jnp.float32) * 0.1
    b0 = jax.random.normal(k1, (1, hidden), jnp.float32) * 0.1
    w1 = jax.random.normal(k2, (hidden, hidden), jnp.float32) * 0.1
    b1 = jax.random.normal(k3, (1, hidden), jnp.float32) * 0.1
    w2 = jax.random.normal(k4, (num_out, hidden), jnp.float32) * 0.1
    b2 = jax.random.normal(k5, (1, num_out), jnp.float32) * 0.1
    return (w0.T, b0, w1.T, b1, w2.T, b2)


# Pure-JAX f32 reference using lax.conv for the correctness check.
def reference_forward(x_nchw, params, tile_width, num_in, num_out, hidden):
    w0t, b0, w1t, b1, w2t, b2 = params
    w0 = w0t.T.reshape(hidden, num_in, tile_width, tile_width)
    w1 = w1t.T.reshape(hidden, hidden, 1, 1)
    w2 = w2t.T.reshape(num_out, hidden, 1, 1)
    dn = jax.lax.conv_dimension_numbers(x_nchw.shape, w0.shape,
                                        ("NCHW", "OIHW", "NCHW"))
    h = jax.lax.conv_general_dilated(x_nchw, w0, (1, 1), "VALID",
                                     dimension_numbers=dn)
    h = jnp.maximum(h + b0[0][None, :, None, None], 0.0)
    h = jax.lax.conv_general_dilated(h, w1, (1, 1), "VALID",
                                     dimension_numbers=dn)
    h = jnp.maximum(h + b1[0][None, :, None, None], 0.0)
    o = jax.lax.conv_general_dilated(h, w2, (1, 1), "VALID",
                                     dimension_numbers=dn)
    return o + b2[0][None, :, None, None]


if __name__ == "__main__":
    # FullyConnected(num_in=4, num_out=8, tile_width=3,
    #                nb_hidden_layers=2, hidden_layer_size=32, non_lin='ReLU')
    num_in, num_out, tile_width, hidden = 4, 8, 3, 32
    N, H, W = 2, 16, 16

    key = jax.random.PRNGKey(0)
    kx, kp = jax.random.split(key)
    x = jax.random.normal(kx, (N, num_in, H, W), jnp.float32)
    params = init_params(kp, num_in, num_out, tile_width, hidden)

    # Small tile_p for the demo so the grid has multiple pipelined steps and
    # exercises the partial last block (P = 2*14*14 = 392 -> 4 row tiles).
    # At production sizes use the default tile_p=2048.
    out = fully_connected_forward(x, params, tile_width=tile_width, tile_p=128)
    out = jax.block_until_ready(out)

    ref = reference_forward(x, params, tile_width, num_in, num_out, hidden)
    ref = jax.block_until_ready(ref)

    assert out.shape == (N, num_out, H - tile_width + 1, W - tile_width + 1)
    # bf16 matmul operands (f32 accumulation) -> relaxed tolerance vs f32 ref.
    np.testing.assert_allclose(np.asarray(out), np.asarray(ref),
                               rtol=2e-2, atol=2e-2)
    print("KERNEL_OK")
</pallas_src>

<mosaic_0001>
module attributes {stable_mosaic.version = 11 : i64} {
  func.func @_mlp_kernel(%arg0: i32, %arg1: memref<128x36xbf16, #tpu.memory_space<vmem>>, %arg2: memref<36x128xbf16, #tpu.memory_space<vmem>>, %arg3: memref<1x128xf32, #tpu.memory_space<vmem>>, %arg4: memref<128x128xbf16, #tpu.memory_space<vmem>>, %arg5: memref<1x128xf32, #tpu.memory_space<vmem>>, %arg6: memref<128x8xbf16, #tpu.memory_space<vmem>>, %arg7: memref<1x8xf32, #tpu.memory_space<vmem>>, %arg8: memref<128x8xf32, #tpu.memory_space<vmem>>) attributes {dimension_semantics = [#tpu.dimension_semantics<parallel>], iteration_bounds = array<i64: 4>, scalar_prefetch = 0 : i64, scratch_operands = 0 : i64, tpu.core_type = #tpu.core_type<tc>, window_params = [{transform_indices = @transform_0, window_bounds = array<i64: 128, 36>}, {pipeline_mode = #tpu.pipeline_mode<synchronous>, transform_indices = @transform_1, window_bounds = array<i64: 36, 128>}, {pipeline_mode = #tpu.pipeline_mode<synchronous>, transform_indices = @transform_2, window_bounds = array<i64: 1, 128>}, {pipeline_mode = #tpu.pipeline_mode<synchronous>, transform_indices = @transform_3, window_bounds = array<i64: 128, 128>}, {pipeline_mode = #tpu.pipeline_mode<synchronous>, transform_indices = @transform_4, window_bounds = array<i64: 1, 128>}, {pipeline_mode = #tpu.pipeline_mode<synchronous>, transform_indices = @transform_5, window_bounds = array<i64: 128, 8>}, {pipeline_mode = #tpu.pipeline_mode<synchronous>, transform_indices = @transform_6, window_bounds = array<i64: 1, 8>}, {transform_indices = @transform_7, window_bounds = array<i64: 128, 8>}]} {
    %c0 = arith.constant 0 : index
    %c0_0 = arith.constant 0 : index
    %0 = vector.load %arg1[%c0, %c0_0] : memref<128x36xbf16, #tpu.memory_space<vmem>>, vector<128x36xbf16>
    %c0_1 = arith.constant 0 : index
    %c0_2 = arith.constant 0 : index
    %1 = vector.load %arg2[%c0_1, %c0_2] : memref<36x128xbf16, #tpu.memory_space<vmem>>, vector<36x128xbf16>
    %cst = arith.constant dense<0.000000e+00> : vector<128x128xf32>
    %2 = tpu.matmul %0, %1, %cst {dimension_numbers = #tpu.dot_dimension_numbers<[1], [0], [0], [1], [0, 0, 1, 1], [], []>} : vector<128x36xbf16>, vector<36x128xbf16>, vector<128x128xf32> -> vector<128x128xf32>
    %c0_3 = arith.constant 0 : index
    %c0_4 = arith.constant 0 : index
    %3 = vector.load %arg3[%c0_3, %c0_4] : memref<1x128xf32, #tpu.memory_space<vmem>>, vector<1x128xf32>
    %4 = vector.broadcast %3 : vector<1x128xf32> to vector<128x128xf32>
    %5 = arith.addf %2, %4 : vector<128x128xf32>
    %cst_5 = arith.constant 0.000000e+00 : f32
    %6 = vector.broadcast %cst_5 : f32 to vector<128x128xf32>
    %7 = arith.maximumf %5, %6 : vector<128x128xf32>
    %8 = arith.truncf %7 : vector<128x128xf32> to vector<128x128xbf16>
    %c0_6 = arith.constant 0 : index
    %c0_7 = arith.constant 0 : index
    %9 = vector.load %arg4[%c0_6, %c0_7] : memref<128x128xbf16, #tpu.memory_space<vmem>>, vector<128x128xbf16>
    %cst_8 = arith.constant dense<0.000000e+00> : vector<128x128xf32>
    %10 = tpu.matmul %8, %9, %cst_8 {dimension_numbers = #tpu.dot_dimension_numbers<[1], [0], [0], [1], [0, 0, 1, 1], [], []>} : vector<128x128xbf16>, vector<128x128xbf16>, vector<128x128xf32> -> vector<128x128xf32>
    %c0_9 = arith.constant 0 : index
    %c0_10 = arith.constant 0 : index
    %11 = vector.load %arg5[%c0_9, %c0_10] : memref<1x128xf32, #tpu.memory_space<vmem>>, vector<1x128xf32>
    %12 = vector.broadcast %11 : vector<1x128xf32> to vector<128x128xf32>
    %13 = arith.addf %10, %12 : vector<128x128xf32>
    %cst_11 = arith.constant 0.000000e+00 : f32
    %14 = vector.broadcast %cst_11 : f32 to vector<128x128xf32>
    %15 = arith.maximumf %13, %14 : vector<128x128xf32>
    %16 = arith.truncf %15 : vector<128x128xf32> to vector<128x128xbf16>
    %c0_12 = arith.constant 0 : index
    %c0_13 = arith.constant 0 : index
    %17 = vector.load %arg6[%c0_12, %c0_13] : memref<128x8xbf16, #tpu.memory_space<vmem>>, vector<128x8xbf16>
    %cst_14 = arith.constant dense<0.000000e+00> : vector<128x8xf32>
    %18 = tpu.matmul %16, %17, %cst_14 {dimension_numbers = #tpu.dot_dimension_numbers<[1], [0], [0], [1], [0, 0, 1, 1], [], []>} : vector<128x128xbf16>, vector<128x8xbf16>, vector<128x8xf32> -> vector<128x8xf32>
    %c0_15 = arith.constant 0 : index
    %c0_16 = arith.constant 0 : index
    %19 = vector.load %arg7[%c0_15, %c0_16] : memref<1x8xf32, #tpu.memory_space<vmem>>, vector<1x8xf32>
    %20 = vector.broadcast %19 : vector<1x8xf32> to vector<128x8xf32>
    %21 = arith.addf %18, %20 : vector<128x8xf32>
    %c0_17 = arith.constant 0 : index
    %c0_18 = arith.constant 0 : index
    %22 = vector.load %arg8[%c0_17, %c0_18] : memref<128x8xf32, #tpu.memory_space<vmem>>, vector<128x8xf32>
    tpu.vector_store %arg8[%c0_17, %c0_18], %21 {strides = array<i32>} : memref<128x8xf32, #tpu.memory_space<vmem>>, vector<128x8xf32>,
    return
  }
  func.func @transform_0(%arg0: i32) -> (i32, i32) {
    %c0_i32 = arith.constant 0 : i32
    %c0_i32_0 = arith.constant 0 : i32
    return %arg0, %c0_i32 : i32, i32
  }
  func.func @transform_1(%arg0: i32) -> (i32, i32) {
    %c0_i32 = arith.constant 0 : i32
    %c0_i32_0 = arith.constant 0 : i32
    %c0_i32_1 = arith.constant 0 : i32
    return %c0_i32, %c0_i32_0 : i32, i32
  }
  func.func @transform_2(%arg0: i32) -> (i32, i32) {
    %c0_i32 = arith.constant 0 : i32
    %c0_i32_0 = arith.constant 0 : i32
    %c0_i32_1 = arith.constant 0 : i32
    return %c0_i32, %c0_i32_0 : i32, i32
  }
  func.func @transform_3(%arg0: i32) -> (i32, i32) {
    %c0_i32 = arith.constant 0 : i32
    %c0_i32_0 = arith.constant 0 : i32
    %c0_i32_1 = arith.constant 0 : i32
    return %c0_i32, %c0_i32_0 : i32, i32
  }
  func.func @transform_4(%arg0: i32) -> (i32, i32) {
    %c0_i32 = arith.constant 0 : i32
    %c0_i32_0 = arith.constant 0 : i32
    %c0_i32_1 = arith.constant 0 : i32
    return %c0_i32, %c0_i32_0 : i32, i32
  }
  func.func @transform_5(%arg0: i32) -> (i32, i32) {
    %c0_i32 = arith.constant 0 : i32
    %c0_i32_0 = arith.constant 0 : i32
    %c0_i32_1 = arith.constant 0 : i32
    return %c0_i32, %c0_i32_0 : i32, i32
  }
  func.func @transform_6(%arg0: i32) -> (i32, i32) {
    %c0_i32 = arith.constant 0 : i32
    %c0_i32_0 = arith.constant 0 : i32
    %c0_i32_1 = arith.constant 0 : i32
    return %c0_i32, %c0_i32_0 : i32, i32
  }
  func.func @transform_7(%arg0: i32) -> (i32, i32) {
    %c0_i32 = arith.constant 0 : i32
    %c0_i32_0 = arith.constant 0 : i32
    return %arg0, %c0_i32 : i32, i32
  }
}

</mosaic_0001>

<bundles_post_ra>
// kernel: fully_connected_forward.1
= control target key start
LH: loop header
LB: loop body
LE: loop exit
PB: predicated region body
PF: predicated region fallthrough
CT: control target
= control target key end

     0   :  { %s1624_s24 = smov 0   ;;  %s1626_s25 = smov 0   ;;  %s1880_s0 = inlined_call_operand.vmem [shape: bf16[392,36], index: 0, kind: input, shape index: {}]   ;;  %s1881_s1 = inlined_call_operand.vmem [shape: bf16[36,128], index: 1, kind: input, shape index: {}]   ;;  %s1882_s2 = inlined_call_operand.vmem [shape: f32[1,128], index: 2, kind: input, shape index: {}]   ;;  %s1883_s3 = inlined_call_operand.vmem [shape: bf16[128,128], index: 3, kind: input, shape index: {}]   ;;  %s1884_s4 = inlined_call_operand.vmem [shape: f32[1,128], index: 4, kind: input, shape index: {}]   ;;  %s1885_s5 = inlined_call_operand.vmem [shape: bf16[128,8], index: 5, kind: input, shape index: {}]   ;;  %s1886_s6 = inlined_call_operand.vmem [shape: f32[1,8], index: 6, kind: input, shape index: {}]   ;;  %s1887_s7 = inlined_call_operand.vmem [shape: f32[392,8], index: 7, kind: output, shape index: {}]  }
   0x1   :  { %s1628_s26 = smov 0  }
   0x2 LB: > { %s1637_s27 = sadd.s32 4294967295, %s1550_s26   ;;  %s1639_s28 = sadd.s32 1, %s1550_s26   ;;  %s1550_s26 = sphi %s1628_s26, %s1894_s26   ;;  %s1546_s25 = sphi %s1626_s25, %s1893_s25   ;;  %s1542_s24 = sphi %s1624_s24, %s1892_s24  }
   0x3   : > { %s173_s29 = ssub.s32 %s1550_s26, %s1639_s28  ;;  %s176_s30 = sadd.s32 1, %s1546_s25 }
   0x4   : > { %p174_p0 = scmp.eq.s32.totalorder %s173_s29, 0  ;;  %p186_p1 = scmp.ne.s32.totalorder %s1546_s25, %s1542_s24 }
   0x5   : > { %p187_p2 = scmp.eq.s32.totalorder %s1637_s27, 3  ;;  %p1189_p3 = scmp.ge.s32.totalorder %s1550_s26, 1 }
   0x6   : > { %s1647_s8 = scalar_select %p174_p0, %s1546_s25, %s176_s30  }
   0x7   : > { %p1649_p4 = por %p187_p2, %p186_p1  ;;  %p246_p5 = scmp.lt.s32.totalorder %s1550_s26, 5 }
   0x9   : > { %p247_p6 = pnand %p1189_p3, %p246_p5 }
   0xa   : > { %v1469_v0 = vld [vmem:[%s1881_s1] sm:$0xff] (!%p247_p6)   ;;  %v1470_v1 = vld [vmem:[%s1881_s1 + $0x8] sm:$0xff] (!%p247_p6)   ;;  %s1660_s14 = sshll.u32 (!%p247_p6), %s1637_s27, 4  ;;  %v1471_v2 = vld [vmem:[%s1881_s1 + $0x10] ss:$0 sps:$4 sm:$0x33] (!%p247_p6)  }
   0xb   : > { %250 = sbr.rel (%p247_p6) target bundleno = 759 (0x2f7), region = 48  ;;  %1294 = vmatprep.subr.bf16.mxu0 (!%p247_p6), %v1469_v0  ;;  %p286_p7 = scmp.lt.s32.totalorder (!%p247_p6), %s1660_s14, 48  ;;  %v1480_v3 = vld [vmem:[%s1883_s3] sm:$0xff] (!%p247_p6)   ;;  %vm409_vm0 = vcmask (!%p247_p6), 1041408   ;;  %v1481_v4 = vld [vmem:[%s1883_s3 + $0x8] sm:$0xff] (!%p247_p6)   ;;  %vm384_vm1 = vcmask (!%p247_p6), 293888  }
   0xc   : > { %1295 = vmatpush3.bf16.msra.mxu0 (!%p247_p6), %v1469_v0  ;;  %1316 = vmatprep.subr.bf16.mxu1 (!%p247_p6), %v1480_v3  ;;  %v1482_v5 = vld [vmem:[%s1883_s3 + $0x10] sm:$0xff] (!%p247_p6)   ;;  %v411_v6 = vsel (!%p247_p6), %vm409_vm0, %v1471_v2, 0  ;;  %v1483_v8 = vld [vmem:[%s1883_s3 + $0x18] sm:$0xff] (!%p247_p6)   ;;  %v1484_v12 = vld [vmem:[%s1883_s3 + $0x20] sm:$0xff] (!%p247_p6)   ;;  %s278_s30 = sand.u32 (!%p247_p6), 1, %s1542_s24   ;;  %vm894_vm2 = vcmask (!%p247_p6), 64512  }
   0xd   : > { %1296 = vmatprep.subr.bf16.mxu0 (!%p247_p6), %v1470_v1  ;;  %1317 = vmatpush3.bf16.msra.mxu1 (!%p247_p6), %v1480_v3  ;;  %v1485_v14 = vld [vmem:[%s1883_s3 + $0x28] sm:$0xff] (!%p247_p6)   ;;  %v1486_v18 = vld [vmem:[%s1883_s3 + $0x30] sm:$0xff] (!%p247_p6)   ;;  %v1487_v19 = vld [vmem:[%s1883_s3 + $0x38] sm:$0xff] (!%p247_p6)   ;;  %s1190_s10 = sshll.u32 (!%p247_p6), %s278_s30, 7 }
   0xe   : > { %1318 = vmatprep.subr.bf16.mxu1 (!%p247_p6), %v1481_v4  ;;  %v1488_v20 = vld [vmem:[%s1885_s5] sm:$0xff] (!%p247_p6)   ;;  %v1489_v21 = vld [vmem:[%s1885_s5 + $0x8] sm:$0xff] (!%p247_p6)   ;;  %v1490_v22 = vld [vmem:[%s1885_s5 + $0x10] sm:$0xff] (!%p247_p6)   ;;  %s1746_s13 = scalar_lea.vmem (!%p247_p6), [#allocation2], %s1190_s10  }
   0xf   : > { %v1491_v23 = vld [vmem:[%s1885_s5 + $0x18] sm:$0xff] (!%p247_p6)   ;;  %v1492_v24 = vld [vmem:[%s1885_s5 + $0x20] sm:$0xff] (!%p247_p6)   ;;  %v1493_v25 = vld [vmem:[%s1885_s5 + $0x28] sm:$0xff] (!%p247_p6)  }
  0x10   : > { %1297 = vmatpush3.bf16.msra.mxu0 (!%p247_p6), %v1470_v1  ;;  %v1193_v26 = vld [vmem:[%s1882_s2] ss:$0 sm:$0xff] (!%p247_p6) }
  0x11   : > { %1380 = vmatprep.subr.msk.bf16.mxu0 (!%p247_p6), %vm409_vm0, %v1471_v2  ;;  %1319 = vmatpush3.bf16.msra.mxu1 (!%p247_p6), %v1481_v4 }
  0x12   : > { %s287_s19 = scalar_select %p286_p7, %s1660_s14, 48  ;;  %1320 = vmatprep.subr.bf16.mxu1 %v1482_v5 }
  0x13   : > { %s919_s24 = ssub.s32 (%p1649_p4), 49, %s1660_s14  ;;  %s1248_s15 = sshll.u32 (%p1649_p4), %s1637_s27, 7 }
  0x14   : > { %s1192_s22 = sshll.u32 %s287_s19, 2  ;;  %1299 = vmatpush3.bf16.msra.mxu0 %v411_v6  ;;  %p920_p8 = scmp.lt.s32.totalorder (%p1649_p4), %s919_s24, 16 }
  0x15   : > { %s1676_s29 = scalar_lea.vmem %s1880_s0, %s1192_s22  ;;  %1321 = vmatpush3.bf16.msra.mxu1 %v1482_v5  ;;  %1348 = vmatprep.subr.bf16.mxu0 %v1488_v20  ;;  %s1787_s18 = scalar_lea.vmem (%p1649_p4), %s1887_s7, %s1248_s15  }
  0x16   : > { %v1472_v7 = vld [vmem:[%s1676_s29] sm:$0xff]   ;;  %v1473_v9 = vld [vmem:[%s1676_s29 + $0x8] sm:$0xff]   ;;  %v1474_v10 = vld [vmem:[%s1676_s29 + $0x10] sm:$0xff]   ;;  %1322 = vmatprep.subr.bf16.mxu1 %v1483_v8 }
  0x17   : > { %1300 = vmatprep.mubr.msk.bf16.mxu0 %vm384_vm1, %v1472_v7  ;;  %v1475_v11 = vld [vmem:[%s1676_s29 + $0x18] sm:$0xff]   ;;  %v1476_v13 = vld [vmem:[%s1676_s29 + $0x20] sm:$0xff]   ;;  %v1477_v15 = vld [vmem:[%s1676_s29 + $0x28] sm:$0xff]  }
  0x18   : > { %1301 = vmatmul.mubr.msk.bf16.vlgmr.msra.gmra.mrb[0].mxu0 %vm384_vm1, %v1473_v9  ;;  %v1478_v16 = vld [vmem:[%s1676_s29 + $0x30] sm:$0xff]   ;;  %v1479_v17 = vld [vmem:[%s1676_s29 + $0x38] sm:$0xff]  }
  0x19   : > { %1304 = vmatprep.mubr.msk.bf16.mxu0 %vm384_vm1, %v1474_v10  ;;  %1323 = vmatpush3.bf16.msra.mxu1 %v1483_v8 }
  0x1a   : > { %1324 = vmatprep.subr.bf16.mxu1 %v1484_v12  ;;  %1349 = vmatpush3.bf16.msra.mxu0 %v1488_v20  ;;  %v1495_v20 = vld [vmem:[%s1885_s5 + $0x38] sm:$0xff]  }
  0x1b   : > { %1350 = vmatprep.subr.bf16.mxu0 %v1489_v21 }
  0x1d   : > { %1325 = vmatpush3.bf16.msra.mxu1 %v1484_v12 }
  0x1e   : > { %1326 = vmatprep.subr.bf16.mxu1 %v1485_v14  ;;  %1351 = vmatpush3.bf16.msra.mxu0 %v1489_v21  ;;  %v1213_v21 = vld [vmem:[%s1884_s4] ss:$0 sm:$0xff] }
  0x1f   : > { %1352 = vmatprep.subr.bf16.mxu0 %v1490_v22 }
  0x20   : > { %1305 = vmatmul.mubr.msk.bf16.gmra.mrb[4].mxu0 %vm384_vm1, %v1475_v11 }
  0x21   : > { %1308 = vmatprep.mubr.msk.bf16.mxu0 %vm384_vm1, %v1476_v13  ;;  %1327 = vmatpush3.bf16.msra.mxu1 %v1485_v14 }
  0x22   : > { %1328 = vmatprep.subr.bf16.mxu1 %v1486_v18  ;;  %1353 = vmatpush3.bf16.msra.mxu0 %v1490_v22 }
  0x23   : > { %1354 = vmatprep.subr.bf16.mxu0 %v1491_v23 }
  0x25   : > { %1329 = vmatpush3.bf16.msra.mxu1 %v1486_v18 }
  0x26   : > { %1330 = vmatprep.subr.bf16.mxu1 %v1487_v19  ;;  %1355 = vmatpush3.bf16.msra.mxu0 %v1491_v23 }
  0x27   : > { %1356 = vmatprep.subr.bf16.mxu0 %v1492_v24 }
  0x28   : > { %1309 = vmatmul.mubr.msk.bf16.gmra.mrb[8].mxu0 %vm384_vm1, %v1477_v15 }
  0x29   : > { %1312 = vmatprep.mubr.msk.bf16.mxu0 %vm384_vm1, %v1478_v16  ;;  %1331 = vmatpush3.bf16.msra.mxu1 %v1487_v19  ;;  %v1494_v19 = vld [vmem:[%s1885_s5 + $0x30] sm:$0xff]  }
  0x2a   : > { %1357 = vmatpush3.bf16.msra.mxu0 %v1492_v24 }
  0x2b   : > { %1358 = vmatprep.subr.bf16.mxu0 %v1493_v25 }
  0x2e   : > { %1359 = vmatpush3.bf16.msra.mxu0 %v1493_v25 }
  0x2f   : > { %1360 = vmatprep.subr.bf16.mxu0 %v1494_v19 }
  0x30   : > { %1313 = vmatmul.mubr.msk.bf16.gmra.mrb[12].mxu0 %vm384_vm1, %v1479_v17 }
  0x32   : > { %1361 = vmatpush3.bf16.msra.mxu0 %v1494_v19 }
  0x33   : > { %1362 = vmatprep.subr.bf16.mxu0 %v1495_v20 }
  0x36   : > { %1363 = vmatpush3.bf16.msra.mxu0 %v1495_v20 }
  0xeb   : > { %v1302_v27 = vpop.f32.mrb[0].mxu0 }
  0xec   : > { %v456_v28 = vadd.f32 %v1302_v27, %v1193_v26  ;;  %v447_v29 = vpop.f32.mrb[1].mxu0 }
  0xed   : > { %v448_v30 = vadd.f32 %v1193_v26, %v447_v29  ;;  %v1303_v31 = vpop.f32.mrb[2].mxu0 }
  0xee   : > { %v459_v32 = vadd.f32 %v1303_v31, %v1193_v26  ;;  %v450_v33 = vpop.f32.mrb[3].mxu0  ;;  %v512_v35 = vmax.f32 %v456_v28, 0.0 }
  0xef   : > { %v451_v34 = vadd.f32 %v1193_v26, %v450_v33  ;;  %v510_v37 = vmax.f32 %v448_v30, 0.0 }
  0xf0   : > { %v513_v36 = vmax.f32 %v459_v32, 0.0 }
  0xf1   : > { %v511_v38 = vmax.f32 %v451_v34, 0.0 }
  0xf2   : > { %v527_v39 = vpack.c.bf16 %v513_v36, %v512_v35 }
  0xf3   : > { %v1306_v40 = vpop.f32.mrb[4].mxu0  ;;  %v526_v41 = vpack.c.bf16 %v511_v38, %v510_v37 }
  0xf4   : > { %v472_v42 = vadd.f32 %v1306_v40, %v1193_v26  ;;  %v463_v43 = vpop.f32.mrb[5].mxu0 }
  0xf5   : > { %v464_v44 = vadd.f32 %v1193_v26, %v463_v43  ;;  %v1307_v45 = vpop.f32.mrb[6].mxu0  ;;  %1332 = vmatprep.mubr.bf16.mxu1 %v526_v41 }
  0xf6   : > { %v475_v46 = vadd.f32 %v1307_v45, %v1193_v26  ;;  %v466_v47 = vpop.f32.mrb[7].mxu0  ;;  %1333 = vmatmul.mubr.bf16.vlgmr.msra.gmra.mrb[0].mxu1 %v527_v39  ;;  %v516_v49 = vmax.f32 %v472_v42, 0.0 }
  0xf7   : > { %v467_v48 = vadd.f32 %v1193_v26, %v466_v47  ;;  %v514_v51 = vmax.f32 %v464_v44, 0.0 }
  0xf8   : > { %v517_v50 = vmax.f32 %v475_v46, 0.0 }
  0xf9   : > { %v515_v52 = vmax.f32 %v467_v48, 0.0 }
  0xfa   : > { %v529_v53 = vpack.c.bf16 %v517_v50, %v516_v49 }
  0xfb   : > { %v528_v54 = vpack.c.bf16 %v515_v52, %v514_v51  ;;  %v1310_v55 = vpop.f32.mrb[8].mxu0 }
  0xfc   : > { %v488_v56 = vadd.f32 %v1310_v55, %v1193_v26  ;;  %v479_v57 = vpop.f32.mrb[9].mxu0 }
  0xfd   : > { %v480_v58 = vadd.f32 %v1193_v26, %v479_v57  ;;  %v1311_v59 = vpop.f32.mrb[10].mxu0  ;;  %1336 = vmatprep.mubr.bf16.mxu1 %v528_v54 }
  0xfe   : > { %v491_v60 = vadd.f32 %v1311_v59, %v1193_v26  ;;  %v482_v61 = vpop.f32.mrb[11].mxu0  ;;  %1337 = vmatmul.mubr.bf16.gmra.mrb[4].mxu1 %v529_v53  ;;  %v520_v63 = vmax.f32 %v488_v56, 0.0 }
  0xff   : > { %v483_v62 = vadd.f32 %v1193_v26, %v482_v61  ;;  %v518_v1 = vmax.f32 %v480_v58, 0.0 }
 0x100   : > { %v521_v0 = vmax.f32 %v491_v60, 0.0 }
 0x101   : > { %v519_v2 = vmax.f32 %v483_v62, 0.0 }
 0x102   : > { %v531_v3 = vpack.c.bf16 %v521_v0, %v520_v63 }
 0x103   : > { %v530_v4 = vpack.c.bf16 %v519_v2, %v518_v1  ;;  %v1314_v5 = vpop.f32.mrb[12].mxu0 }
 0x104   : > { %v504_v6 = vadd.f32 %v1314_v5, %v1193_v26  ;;  %v495_v7 = vpop.f32.mrb[13].mxu0 }
 0x105   : > { %v496_v8 = vadd.f32 %v1193_v26, %v495_v7  ;;  %v1315_v9 = vpop.f32.mrb[14].mxu0  ;;  %1340 = vmatprep.mubr.bf16.mxu1 %v530_v4 }
 0x106   : > { %v507_v10 = vadd.f32 %v1315_v9, %v1193_v26  ;;  %v498_v11 = vpop.f32.mrb[15].mxu0  ;;  %1341 = vmatmul.mubr.bf16.gmra.mrb[8].mxu1 %v531_v3  ;;  %v524_v13 = vmax.f32 %v504_v6, 0.0 }
 0x107   : > { %v499_v12 = vadd.f32 %v1193_v26, %v498_v11  ;;  %v522_v15 = vmax.f32 %v496_v8, 0.0 }
 0x108   : > { %v525_v14 = vmax.f32 %v507_v10, 0.0 }
 0x109   : > { %v523_v16 = vmax.f32 %v499_v12, 0.0 }
 0x10a   : > { %v533_v17 = vpack.c.bf16 %v525_v14, %v524_v13  ;;  %v1222_v14 = vld [vmem:[%s1886_s6] ss:$0 sm:$0xff] }
 0x10b   : > { %v532_v18 = vpack.c.bf16 %v523_v16, %v522_v15 }
 0x10d   : > { %1344 = vmatprep.mubr.bf16.mxu1 %v532_v18 }
 0x10e   : > { %1345 = vmatmul.mubr.bf16.gmra.mrb[12].mxu1 %v533_v17 }
 0x1c9   : > { %v1334_v22 = vpop.f32.mrb[0].mxu1 }
 0x1ca   : > { %v648_v23 = vadd.f32 %v1334_v22, %v1213_v21  ;;  %v639_v24 = vpop.f32.mrb[1].mxu1 }
 0x1cb   : > { %v640_v25 = vadd.f32 %v1213_v21, %v639_v24  ;;  %v1335_v26 = vpop.f32.mrb[2].mxu1 }
 0x1cc   : > { %v651_v27 = vadd.f32 %v1335_v26, %v1213_v21  ;;  %v642_v28 = vpop.f32.mrb[3].mxu1  ;;  %v704_v30 = vmax.f32 %v648_v23, 0.0 }
 0x1cd   : > { %v643_v29 = vadd.f32 %v1213_v21, %v642_v28  ;;  %v702_v32 = vmax.f32 %v640_v25, 0.0 }
 0x1ce   : > { %v705_v31 = vmax.f32 %v651_v27, 0.0 }
 0x1cf   : > { %v703_v33 = vmax.f32 %v643_v29, 0.0 }
 0x1d0   : > { %v719_v34 = vpack.c.bf16 %v705_v31, %v704_v30 }
 0x1d1   : > { %v718_v35 = vpack.c.bf16 %v703_v33, %v702_v32  ;;  %v1338_v36 = vpop.f32.mrb[4].mxu1 }
 0x1d2   : > { %v664_v37 = vadd.f32 %v1338_v36, %v1213_v21  ;;  %v655_v38 = vpop.f32.mrb[5].mxu1 }
 0x1d3   : > { %v656_v39 = vadd.f32 %v1213_v21, %v655_v38  ;;  %v1339_v40 = vpop.f32.mrb[6].mxu1  ;;  %1364 = vmatprep.mubr.bf16.mxu0 %v718_v35 }
 0x1d4   : > { %v667_v41 = vadd.f32 %v1339_v40, %v1213_v21  ;;  %v658_v42 = vpop.f32.mrb[7].mxu1  ;;  %1365 = vmatmul.mubr.bf16.vlgmr.msra.gmra.mrb[16].mxu0 %v719_v34  ;;  %v708_v44 = vmax.f32 %v664_v37, 0.0 }
 0x1d5   : > { %v659_v43 = vadd.f32 %v1213_v21, %v658_v42  ;;  %v706_v46 = vmax.f32 %v656_v39, 0.0 }
 0x1d6   : > { %v709_v45 = vmax.f32 %v667_v41, 0.0 }
 0x1d7   : > { %v707_v47 = vmax.f32 %v659_v43, 0.0 }
 0x1d8   : > { %v721_v48 = vpack.c.bf16 %v709_v45, %v708_v44 }
 0x1d9   : > { %v720_v49 = vpack.c.bf16 %v707_v47, %v706_v46  ;;  %v1342_v50 = vpop.f32.mrb[8].mxu1 }
 0x1da   : > { %v680_v51 = vadd.f32 %v1342_v50, %v1213_v21  ;;  %v671_v52 = vpop.f32.mrb[9].mxu1 }
 0x1db   : > { %v672_v53 = vadd.f32 %v1213_v21, %v671_v52  ;;  %v1343_v54 = vpop.f32.mrb[10].mxu1  ;;  %1368 = vmatprep.mubr.bf16.mxu0 %v720_v49 }
 0x1dc   : > { %v683_v55 = vadd.f32 %v1343_v54, %v1213_v21  ;;  %v674_v56 = vpop.f32.mrb[11].mxu1  ;;  %1369 = vmatmul.mubr.bf16.gmra.mrb[20].mxu0 %v721_v48  ;;  %v712_v58 = vmax.f32 %v680_v51, 0.0 }
 0x1dd   : > { %v675_v57 = vadd.f32 %v1213_v21, %v674_v56  ;;  %v710_v60 = vmax.f32 %v672_v53, 0.0 }
 0x1de   : > { %v713_v59 = vmax.f32 %v683_v55, 0.0 }
 0x1df   : > { %v711_v61 = vmax.f32 %v675_v57, 0.0 }
 0x1e0   : > { %v723_v62 = vpack.c.bf16 %v713_v59, %v712_v58 }
 0x1e1   : > { %v722_v63 = vpack.c.bf16 %v711_v61, %v710_v60  ;;  %v1346_v0 = vpop.f32.mrb[12].mxu1 }
 0x1e2   : > { %v696_v1 = vadd.f32 %v1346_v0, %v1213_v21  ;;  %v687_v2 = vpop.f32.mrb[13].mxu1 }
 0x1e3   : > { %v688_v3 = vadd.f32 %v1213_v21, %v687_v2  ;;  %v1347_v4 = vpop.f32.mrb[14].mxu1  ;;  %1372 = vmatprep.mubr.bf16.mxu0 %v722_v63 }
 0x1e4   : > { %v699_v5 = vadd.f32 %v1347_v4, %v1213_v21  ;;  %v690_v6 = vpop.f32.mrb[15].mxu1  ;;  %1373 = vmatmul.mubr.bf16.gmra.mrb[24].mxu0 %v723_v62  ;;  %v716_v8 = vmax.f32 %v696_v1, 0.0 }
 0x1e5   : > { %v691_v7 = vadd.f32 %v1213_v21, %v690_v6  ;;  %v714_v10 = vmax.f32 %v688_v3, 0.0 }
 0x1e6   : > { %v717_v9 = vmax.f32 %v699_v5, 0.0 }
 0x1e7   : > { %v715_v11 = vmax.f32 %v691_v7, 0.0 }
 0x1e8   : > { %v725_v12 = vpack.c.bf16 %v717_v9, %v716_v8 }
 0x1e9   : > { %v724_v13 = vpack.c.bf16 %v715_v11, %v714_v10 }
 0x1eb   : > { %1376 = vmatprep.mubr.bf16.mxu0 %v724_v13 }
 0x1ec   : > { %1377 = vmatmul.mubr.bf16.gmra.mrb[28].mxu0 %v725_v12 }
 0x2a7   : > { %v1366_v15 = vpop.f32.mrb[16].mxu0 }
 0x2a8   : > { %v840_v16 = vadd.f32 %v1366_v15, %v1222_v14  ;;  %v831_v17 = vpop.f32.mrb[17].mxu0 }
 0x2a9   : > { %v832_v18 = vadd.f32 %v1222_v14, %v831_v17  ;;  %v1367_v19 = vpop.f32.mrb[18].mxu0 }
 0x2aa   : > { %897 = vst.msk [vmem:[%s1746_s13 + $0x10] sm:$0xff] %vm894_vm2, %v840_v16  ;;  %v843_v20 = vadd.f32 %v1367_v19, %v1222_v14  ;;  %v834_v21 = vpop.f32.mrb[19].mxu0 }
 0x2ab   : > { %895 = vst.msk [vmem:[%s1746_s13] sm:$0xff] %vm894_vm2, %v832_v18  ;;  %v835_v22 = vadd.f32 %v1222_v14, %v834_v21 }
 0x2ac   : > { %898 = vst.msk [vmem:[%s1746_s13 + $0x18] sm:$0xff] %vm894_vm2, %v843_v20 }
 0x2ad   : > { %896 = vst.msk [vmem:[%s1746_s13 + $0x8] sm:$0xff] %vm894_vm2, %v835_v22 }
 0x2af   : > { %v1370_v23 = vpop.f32.mrb[20].mxu0 }
 0x2b0   : > { %v856_v24 = vadd.f32 %v1370_v23, %v1222_v14  ;;  %v847_v25 = vpop.f32.mrb[21].mxu0 }
 0x2b1   : > { %v848_v26 = vadd.f32 %v1222_v14, %v847_v25  ;;  %v1371_v27 = vpop.f32.mrb[22].mxu0 }
 0x2b2   : > { %901 = vst.msk [vmem:[%s1746_s13 + $0x30] sm:$0xff] %vm894_vm2, %v856_v24  ;;  %v859_v28 = vadd.f32 %v1371_v27, %v1222_v14  ;;  %v850_v29 = vpop.f32.mrb[23].mxu0 }
 0x2b3   : > { %899 = vst.msk [vmem:[%s1746_s13 + $0x20] sm:$0xff] %vm894_vm2, %v848_v26  ;;  %v851_v30 = vadd.f32 %v1222_v14, %v850_v29 }
 0x2b4   : > { %902 = vst.msk [vmem:[%s1746_s13 + $0x38] sm:$0xff] %vm894_vm2, %v859_v28 }
 0x2b5   : > { %900 = vst.msk [vmem:[%s1746_s13 + $0x28] sm:$0xff] %vm894_vm2, %v851_v30 }
 0x2b7   : > { %v1374_v31 = vpop.f32.mrb[24].mxu0 }
 0x2b8   : > { %v872_v32 = vadd.f32 %v1374_v31, %v1222_v14  ;;  %v863_v33 = vpop.f32.mrb[25].mxu0 }
 0x2b9   : > { %v864_v34 = vadd.f32 %v1222_v14, %v863_v33  ;;  %v1375_v35 = vpop.f32.mrb[26].mxu0 }
 0x2ba   : > { %905 = vst.msk [vmem:[%s1746_s13 + $0x50] sm:$0xff] %vm894_vm2, %v872_v32  ;;  %v875_v36 = vadd.f32 %v1375_v35, %v1222_v14  ;;  %v866_v37 = vpop.f32.mrb[27].mxu0 }
 0x2bb   : > { %903 = vst.msk [vmem:[%s1746_s13 + $0x40] sm:$0xff] %vm894_vm2, %v864_v34  ;;  %v867_v38 = vadd.f32 %v1222_v14, %v866_v37 }
 0x2bc   : > { %906 = vst.msk [vmem:[%s1746_s13 + $0x58] sm:$0xff] %vm894_vm2, %v875_v36 }
 0x2bd   : > { %904 = vst.msk [vmem:[%s1746_s13 + $0x48] sm:$0xff] %vm894_vm2, %v867_v38 }
 0x2bf   : > { %v1378_v39 = vpop.f32.mrb[28].mxu0  ;;  %917 = sbr.rel (!%p1649_p4) target bundleno = 759 (0x2f7), region = 52 }
 0x2c0   : > { %v888_v40 = vadd.f32 %v1378_v39, %v1222_v14  ;;  %v879_v41 = vpop.f32.mrb[29].mxu0 }
 0x2c1   : > { %v880_v42 = vadd.f32 %v1222_v14, %v879_v41  ;;  %v1379_v43 = vpop.f32.mrb[30].mxu0 }
 0x2c2   : > { %909 = vst.msk [vmem:[%s1746_s13 + $0x70] sm:$0xff] %vm894_vm2, %v888_v40  ;;  %v891_v44 = vadd.f32 %v1379_v43, %v1222_v14  ;;  %v882_v45 = vpop.f32.mrb[31].mxu0 }
 0x2c3   : > { %907 = vst.msk [vmem:[%s1746_s13 + $0x60] sm:$0xff] %vm894_vm2, %v880_v42  ;;  %v883_v46 = vadd.f32 %v1222_v14, %v882_v45 }
 0x2c4   : > { %910 = vst.msk [vmem:[%s1746_s13 + $0x78] sm:$0xff] %vm894_vm2, %v891_v44 }
 0x2c5   : > { %908 = vst.msk [vmem:[%s1746_s13 + $0x68] sm:$0xff] %vm894_vm2, %v883_v46 }
 0x2c6   : > { %s1896_s24 = smov (!%p920_p8, %s919_s24), 16 }
 0x2c7   : > { %s1233_s19 = sshll.u32 %s1896_s24, 7 }
 0x2c8   : > { %p1236_p9 = scmp.eq.s32.totalorder %s1233_s19, 0 }
 0x2c9   : > { %s1793_s20 = sshrl.u32 (!%p1236_p9), %s1896_s24, 4 }
 0x2ca   : > { %928 = sbr.rel (%p1236_p9) target bundleno = 759 (0x2f7), region = 56  ;;  %p1237_p10 = scmp.le.s32.totalorder (!%p1236_p9), %s1793_s20, 0 }
 0x2d1   : > { %1142 = sbr.rel (%p1237_p10) target bundleno = 738 (0x2e2), region = 132  ;;  %s1889_s27 = smov (!%p1237_p10), %s1787_s18 }
 0x2d2   : > { %s1890_s9 = smov (!%p1237_p10), %s1746_s13  ;;  %s1802_s14 = smov (!%p1237_p10), 0  }
 0x2d3   : > { %s1804_s21 = smov (!%p1237_p10), 0  }
 0x2d8 LB: >> { %v1020_v47 = vld [vmem:[%s1558_s9] sm:$0xff]  ;;  %v1022_v48 = vld [vmem:[%s1558_s9 + $0x8] sm:$0xff]  ;;  %v1024_v49 = vld [vmem:[%s1558_s9 + $0x10] sm:$0xff]  ;;  %s1052_s22 = sadd.s32 1, %s1562_s14  ;;  %s1014_s21 = sadd.s32 1, %s1566_s21   ;;  %s1566_s21 = sphi %s1804_s21, %s1014_s21   ;;  %s1562_s14 = sphi %s1802_s14, %s1891_s14   ;;  %s1558_s9 = sphi %s1890_s9, %s1057_s9   ;;  %s1554_s27 = sphi %s1889_s27, %s1058_s27  }
 0x2d9   : >> { %1021 = vst [vmem:[%s1554_s27] sm:$0xff] %v1020_v47  ;;  %1023 = vst [vmem:[%s1554_s27 + $0x8] sm:$0xff] %v1022_v48  ;;  %v1026_v50 = vld [vmem:[%s1558_s9 + $0x18] sm:$0xff]  ;;  %v1028_v51 = vld [vmem:[%s1558_s9 + $0x20] sm:$0xff]  ;;  %p1053_p11 = scmp.ge.s32.totalorder %s1052_s22, %s1793_s20  ;;  %p1013_p12 = scmp.ge.s32.totalorder %s1014_s21, %s1793_s20 }
 0x2da   : >> { %1025 = vst [vmem:[%s1554_s27 + $0x10] sm:$0xff] %v1024_v49  ;;  %v1030_v52 = vld [vmem:[%s1558_s9 + $0x28] sm:$0xff]  ;;  %1027 = vst [vmem:[%s1554_s27 + $0x18] sm:$0xff] %v1026_v50  ;;  %v1032_v53 = vld [vmem:[%s1558_s9 + $0x30] sm:$0xff] }
 0x2db   : >> { %1029 = vst [vmem:[%s1554_s27 + $0x20] sm:$0xff] %v1028_v51  ;;  %1031 = vst [vmem:[%s1554_s27 + $0x28] sm:$0xff] %v1030_v52  ;;  %v1034_v54 = vld [vmem:[%s1558_s9 + $0x38] sm:$0xff]  ;;  %v1036_v55 = vld [vmem:[%s1558_s9 + $0x40] sm:$0xff]  ;;  %s1898_s22 = smov (%p1053_p11, %s1052_s22), 0  ;;  %1016 = sbr.rel (!%p1013_p12) target bundleno = 728 (0x2d8), region = 138 }
 0x2dc   : >> { %1033 = vst [vmem:[%s1554_s27 + $0x30] sm:$0xff] %v1032_v53  ;;  %1035 = vst [vmem:[%s1554_s27 + $0x38] sm:$0xff] %v1034_v54  ;;  %v1038_v56 = vld [vmem:[%s1558_s9 + $0x48] sm:$0xff]  ;;  %v1040_v57 = vld [vmem:[%s1558_s9 + $0x50] sm:$0xff]  ;;  %s1238_s23 = sshll.u32 %s1898_s22, 7  ;;  %s1891_s14 = smov %s1898_s22 }
 0x2dd   : >> { %1037 = vst [vmem:[%s1554_s27 + $0x40] sm:$0xff] %v1036_v55  ;;  %v1042_v58 = vld [vmem:[%s1558_s9 + $0x58] sm:$0xff]  ;;  %1039 = vst [vmem:[%s1554_s27 + $0x48] sm:$0xff] %v1038_v56  ;;  %v1044_v59 = vld [vmem:[%s1558_s9 + $0x60] sm:$0xff] }
 0x2de   : >> { %1041 = vst [vmem:[%s1554_s27 + $0x50] sm:$0xff] %v1040_v57  ;;  %1043 = vst [vmem:[%s1554_s27 + $0x58] sm:$0xff] %v1042_v58  ;;  %v1046_v60 = vld [vmem:[%s1558_s9 + $0x68] sm:$0xff]  ;;  %v1048_v61 = vld [vmem:[%s1558_s9 + $0x70] sm:$0xff] }
 0x2df   : >> { %1045 = vst [vmem:[%s1554_s27 + $0x60] sm:$0xff] %v1044_v59  ;;  %1047 = vst [vmem:[%s1554_s27 + $0x68] sm:$0xff] %v1046_v60  ;;  %v1050_v62 = vld [vmem:[%s1558_s9 + $0x78] sm:$0xff]  ;;  %s1057_s9 = scalar_lea.vmem %s1746_s13, %s1238_s23 [#allocation2]  }
 0x2e0   : >> { %1049 = vst [vmem:[%s1554_s27 + $0x70] sm:$0xff] %v1048_v61  ;;  %1051 = vst [vmem:[%s1554_s27 + $0x78] sm:$0xff] %v1050_v62  ;;  %s1058_s27 = scalar_lea.vmem %s1787_s18, %s1238_s23  }
 0x2e2 PF: > { %s1862_s26 = sand.u32 15, %s1896_s24   ;;  %s1249_s29 = sshll.u32 %s1793_s20, 7 }
 0x2e3   : > { %s1063_s30 = scalar_lea.vmem %s1746_s13, %s1249_s29 [#allocation2]   ;;  %s1065_s10 = scalar_lea.vmem %s1787_s18, %s1249_s29  }
 0x2e4   : > { %p1243_p13 = scmp.le.s32.totalorder %s1862_s26, 0 }
 0x2e5   : > { %s1568_s11 = smov (!%p1243_p13), %s1065_s10   ;;  %s1572_s12 = smov (!%p1243_p13), %s1063_s30  }
 0x2e6   : > { %1156 = sbr.rel (%p1243_p13) target bundleno = 759 (0x2f7), region = 143  ;;  %s1576_s15 = smov (!%p1243_p13), 0  }
 0x2e7   : > { %s1580_s16 = smov (!%p1243_p13), 0  }
 0x2ed LB: >> { %v1075_v63 = vld [vmem:[%s1574_s12] sm:$0xff]  ;;  %s1077_s24 = sadd.s32 1, %s1578_s15  ;;  %s1069_s16 = sadd.s32 1, %s1582_s16   ;;  %s1582_s16 = sphi %s1580_s16, %s1069_s16   ;;  %s1578_s15 = sphi %s1576_s15, %s1577_s15   ;;  %s1574_s12 = sphi %s1572_s12, %s1082_s12   ;;  %s1570_s11 = sphi %s1568_s11, %s1083_s11  }
 0x2ee   : >> { %1076 = vst [vmem:[%s1570_s11] sm:$0xff] %v1075_v63  ;;  %p1078_p0 = scmp.ge.s32.totalorder %s1077_s24, %s1862_s26  ;;  %p1068_p1 = scmp.ge.s32.totalorder %s1069_s16, %s1862_s26 }
 0x2f0   : >> { %s1900_s24 = smov (%p1078_p0, %s1077_s24), 0  ;;  %1071 = sbr.rel (!%p1068_p1) target bundleno = 749 (0x2ed), region = 149 }
 0x2f1   : >> { %s1244_s13 = sshll.u32 %s1900_s24, 3  ;;  %s1577_s15 = smov %s1900_s24  }
 0x2f2   : >> { %s1082_s12 = scalar_lea.vmem %s1063_s30, %s1244_s13 [#allocation2]   ;;  %s1083_s11 = scalar_lea.vmem %s1065_s10, %s1244_s13  }
 0x2f7 PF: > { %p14_p2 = scmp.ge.s32.totalorder %s1639_s28, 6   ;;  %s1892_s24 = smov %s1546_s25 }
 0x2f8   : > { %s1893_s25 = smov %s1647_s8  ;;  %s1894_s26 = smov %s1639_s28 }
 0x2f9   :  { %16 = sbr.rel (!%p14_p2) target bundleno = 2 (0x2), region = 160 }

</bundles_post_ra>
